<compile_context>
chip_gen: v7x
topology: tpu7x:2x2x1
jax: 0.10.0
libtpu: 0.0.40
codegen_flags: <defaults>
</compile_context>

<pallas_src>
import functools

import jax
import jax.numpy as jnp
from jax import lax
from jax.experimental import pallas as pl
from jax.experimental.pallas import tpu as pltpu

_LANE = 128
_SUBLANE = 8
_MiB = 1 << 20


def _round_up(v, m):
    return ((v + m - 1) // m) * m


def _round_down(v, m):
    return (v // m) * m


def _check_buffered():
    """One-time feature check for pl.Buffered / BlockSpec(pipeline_mode=...)."""
    if not hasattr(pl, "Buffered"):
        return False
    try:
        pl.BlockSpec((8, 128), lambda i: (i, 0), pipeline_mode=pl.Buffered(1))
        return True
    except Exception:
        return False


_HAS_BUFFERED = _check_buffered()


@functools.lru_cache(maxsize=1)
def _vmem_capacity_bytes():
    try:
        return int(pltpu.get_tpu_info().vmem_capacity_bytes)
    except Exception:
        return 128 * _MiB  # v5e / v6e default


def _w_block_spec(block_shape, index_map, single_buffer):
    if single_buffer and _HAS_BUFFERED:
        return pl.BlockSpec(block_shape, index_map, pipeline_mode=pl.Buffered(1))
    return pl.BlockSpec(block_shape, index_map)


# --------------------------------------------------------------------------- #
# Kernels
# --------------------------------------------------------------------------- #
def _make_single_out_kernel(compute_dtype):
    # grid = (batch_tiles,). The full padded weight is resident, so x is read from
    # HBM exactly once. The batch axis may be megacore-parallel (v7x), so the
    # square/cast is done unconditionally each step (negligible: ~1/(2*tb) of the
    # matmul FLOPs, on the VPU while the MXU runs).
    def kernel(x_ref, w_ref, b_ref, o_ref):
        w = w_ref[...]
        w2 = (w * w).astype(compute_dtype)
        acc = lax.dot_general(
            x_ref[...].astype(compute_dtype), w2,
            dimension_numbers=(((1,), (1,)), ((), ())),   # contract shared in_f axis
            preferred_element_type=jnp.float32)
        acc = acc + b_ref[...].astype(jnp.float32)
        o_ref[...] = acc.astype(o_ref.dtype)
    return kernel


def _multi_out_kernel(x_ref, w_ref, b_ref, o_ref, w2_ref):
    # grid = (out_tiles, batch_tiles). NOTE: the inner (batch) axis MUST stay
    # "arbitrary" (sequential, starting at 0 for every out tile) -- the squared
    # weight is recomputed only at the first batch step of each resident out tile.
    @pl.when(pl.program_id(1) == 0)
    def _():
        w = w_ref[...]
        w2_ref[...] = (w * w).astype(w2_ref.dtype)

    acc = lax.dot_general(
        x_ref[...].astype(w2_ref.dtype), w2_ref[...],
        dimension_numbers=(((1,), (1,)), ((), ())),
        preferred_element_type=jnp.float32)
    acc = acc + b_ref[...].astype(jnp.float32)
    o_ref[...] = acc.astype(o_ref.dtype)


def _make_ktiled_kernel(compute_dtype):
    # grid = (out_tiles, batch_tiles, k_tiles); reduction (K) axis innermost,
    # accumulated in an f32 VMEM scratch. Per-step squaring of the (tn, tk) weight
    # tile is ~1/(2*tb) of the matmul FLOPs.
    def kernel(x_ref, w_ref, b_ref, o_ref, acc_ref):
        k = pl.program_id(2)

        @pl.when(k == 0)
        def _():
            acc_ref[...] = jnp.zeros_like(acc_ref)

        w = w_ref[...]
        w2 = (w * w).astype(compute_dtype)
        acc_ref[...] += lax.dot_general(
            x_ref[...].astype(compute_dtype), w2,
            dimension_numbers=(((1,), (1,)), ((), ())),
            preferred_element_type=jnp.float32)

        @pl.when(k == pl.num_programs(2) - 1)
        def _():
            o_ref[...] = (acc_ref[...] + b_ref[...].astype(jnp.float32)
                          ).astype(o_ref.dtype)
    return kernel


# --------------------------------------------------------------------------- #
# Wrapper
# --------------------------------------------------------------------------- #
def positive_linear(x, log_weight, bias=None, *, use_bf16=True, out_dtype=None,
                    tb=None, tn=None, tk=None, force_pallas=False):
    """Pallas implementation of PositiveLinear.forward.

    x:          (B, in_features)
    log_weight: (out_features, in_features)
    bias:       optional (out_features,)
    use_bf16:   feed the MXU bf16 operands (f32 accumulation); False = f32 path.
    out_dtype:  output dtype (default: x.dtype).
    tb/tn/tk:   optional tile overrides (mainly for testing); tk forces K tiling.
    """
    B, in_f = x.shape
    out_f, in_f2 = log_weight.shape
    assert in_f == in_f2, "in_features mismatch"

    orig_dtype = x.dtype
    out_dtype = jnp.dtype(out_dtype) if out_dtype is not None else jnp.dtype(orig_dtype)

    # Small-problem fallback: for tiny layers the pallas_call launch / pad / slice
    # overhead exceeds the work; XLA fuses the square into the dot and wins.
    if (not force_pallas and tb is None and tn is None and tk is None
            and B * in_f <= 64 * 1024 and out_f <= _LANE):
        w2 = log_weight * log_weight
        y = jnp.dot(x, w2.T, preferred_element_type=jnp.float32)
        if bias is not None:
            y = y + bias.astype(jnp.float32)
        return y.astype(out_dtype)

    # ---- generation-aware parameters ---------------------------------------
    vmem_cap = _vmem_capacity_bytes()
    small_vmem = vmem_cap <= 80 * _MiB           # v7x-class (64 MiB per TensorCore)
    budget = int(0.80 * vmem_cap)                # ~102 MiB on v5e/v6e, ~51 MiB on v7x

    if small_vmem:
        tn_cap, tn_step, tb_floor = 256, 256, 256
    else:
        tn_cap, tn_step, tb_floor = 512, 128, 128

    compute_dtype = jnp.bfloat16 if use_bf16 else jnp.float32
    cb = jnp.dtype(compute_dtype).itemsize
    ob = out_dtype.itemsize
    x_bytes = x.dtype.itemsize

    out_aligned = _round_up(out_f, _LANE)        # lane-dense output floor

    # ---- batch tile ----------------------------------------------------------
    user_tb = tb is not None
    if user_tb:
        tb_ = max(1, min(int(tb), B))
        if tb_ < B:
            tb_ = max(_SUBLANE, _round_down(tb_, _SUBLANE))
    else:
        tb_ = min(512, B)
        if tb_ < B:
            tb_ = max(_SUBLANE, _round_down(tb_, _SUBLANE))
    tb_floor = min(tb_floor, tb_)

    def fed_x_bytes(n_out):
        # x is pre-cast to bf16 in the wrapper only when it is re-streamed (n_out>=2).
        return cb if (use_bf16 and n_out >= 2) else x_bytes

    def est_no_k(tb_c, tn_c, n_out):
        xb = fed_x_bytes(n_out)
        wbufs = 1 if (small_vmem and _HAS_BUFFERED) else 2
        e = (2 * tb_c * in_f * xb              # double-buffered x tiles
             + wbufs * tn_c * in_f * 4         # weight tile buffers (f32)
             + tn_c * in_f * cb                # squared weight (scratch or temp)
             + tb_c * tn_c * 4                 # f32 matmul accumulator intermediate
             + 2 * tb_c * tn_c * ob            # double-buffered output tiles
             + 2 * tn_c * 4)                   # bias tile
        if xb != cb:
            e += tb_c * in_f * cb              # in-kernel x cast temporary
        return e

    def est_k(tb_c, tn_c, tk_c, n_out):
        xb = fed_x_bytes(n_out)
        e = (2 * tb_c * tk_c * xb
             + 2 * tn_c * tk_c * 4
             + tn_c * tk_c * cb
             + tb_c * tn_c * 4                 # f32 accumulator scratch
             + 2 * tb_c * tn_c * ob
             + 2 * tn_c * 4)
        if xb != cb:
            e += tb_c * tk_c * cb
        return e

    def shrink_tb(tb_c, tn_c, tk_c=None, n_out=1, k_tiled=False):
        # Halve tb (multiples of 8) down to the per-generation floor; only then
        # does the caller start shrinking tn / tk.
        while True:
            e = (est_k(tb_c, tn_c, tk_c, n_out) if k_tiled
                 else est_no_k(tb_c, tn_c, n_out))
            if e <= budget or tb_c <= tb_floor or user_tb:
                return tb_c, e
            tb_c = max(tb_floor,
                       _round_down(max(_SUBLANE, tb_c // 2), _SUBLANE))

    # ---- tile selection ------------------------------------------------------
    chosen = None

    if tk is None:
        if tn is not None:
            tn_cands = [min(out_aligned, max(_LANE, _round_up(int(tn), _LANE)))]
        else:
            # Prefer the full (padded) out dim -> single pass over x; then halvings
            # down to the per-generation cap, then cap - step ... down to 128.
            tn_cands = []
            t = out_aligned
            while t > tn_cap:
                if t not in tn_cands:
                    tn_cands.append(t)
                t = max(tn_cap, _round_up((t + 1) // 2, _LANE))
            t = min(tn_cap, out_aligned)
            while t >= _LANE:
                if t not in tn_cands:
                    tn_cands.append(t)
                t -= tn_step

        for tn_try in tn_cands:
            out_p_try = _round_up(out_f, tn_try)
            n_out_try = out_p_try // tn_try
            tb_try, e = shrink_tb(tb_, tn_try, n_out=n_out_try, k_tiled=False)
            if e <= budget or (tn is not None and user_tb):
                chosen = dict(k_tiled=False, tb=tb_try, tn=tn_try, tk=in_f,
                              n_out=n_out_try, est=e)
                break

    if chosen is None:
        # K (in_features) tiling: very large in_features (or user-forced tk).
        tk_try = (min(_round_up(in_f, _LANE), 512) if tk is None
                  else max(_LANE, _round_up(int(tk), _LANE)))
        tk_try = min(tk_try, _round_up(in_f, _LANE))
        tn_try = (min(tn_cap, out_aligned) if tn is None
                  else min(out_aligned, max(_LANE, _round_up(int(tn), _LANE))))
        tb_try = tb_
        while True:
            out_p_try = _round_up(out_f, tn_try)
            n_out_try = out_p_try // tn_try
            tb_try, e = shrink_tb(tb_try, tn_try, tk_c=tk_try,
                                  n_out=n_out_try, k_tiled=True)
            if e <= budget:
                break
            if tn is None and tn_try - tn_step >= _LANE:
                tn_try -= tn_step
                continue
            if tk is None and tk_try > _LANE:
                tk_try = max(_LANE, _round_up(tk_try // 2, _LANE))
                continue
            break  # proceed with minimal tiles; let the compiler have it
        chosen = dict(k_tiled=True, tb=tb_try, tn=tn_try, tk=tk_try,
                      n_out=n_out_try, est=e)

    k_tiled = chosen["k_tiled"]
    tb_f, tn_f, tk_f, n_out = chosen["tb"], chosen["tn"], chosen["tk"], chosen["n_out"]
    out_p = _round_up(out_f, tn_f)
    vmem_limit = int(min(vmem_cap, max(chosen["est"] + 8 * _MiB, 32 * _MiB)))

    # ---- operand preparation -------------------------------------------------
    w = log_weight
    b_vec = bias if bias is not None else jnp.zeros((out_f,), jnp.float32)
    if out_p != out_f:
        w = jnp.pad(w, ((0, out_p - out_f), (0, 0)))
        b_vec = jnp.pad(b_vec, (0, out_p - out_f))
    b2d = b_vec.reshape(1, out_p)

    x_fed = x
    if use_bf16 and n_out >= 2 and x_fed.dtype != compute_dtype:
        # x is re-streamed from HBM once per out tile -> feed it as bf16 to halve the
        # dominant HBM read. (The weight is read once, so it is NOT pre-squared/cast.)
        x_fed = x_fed.astype(compute_dtype)

    in_p = in_f
    if k_tiled:
        in_p = _round_up(in_f, tk_f)
        if in_p != in_f:  # zero-pad K: zeros square to zeros and add nothing
            x_fed = jnp.pad(x_fed, ((0, 0), (0, in_p - in_f)))
            w = jnp.pad(w, ((0, 0), (0, in_p - in_f)))

    n_batch = pl.cdiv(B, tb_f)
    out_shape = jax.ShapeDtypeStruct((B, out_p), out_dtype)

    # ---- grid / specs / kernel per path --------------------------------------
    if k_tiled:
        grid = (n_out, n_batch, in_p // tk_f)
        x_spec = pl.BlockSpec((tb_f, tk_f), lambda j, i, k: (i, k))
        w_spec = pl.BlockSpec((tn_f, tk_f), lambda j, i, k: (j, k))
        b_spec = pl.BlockSpec((1, tn_f), lambda j, i, k: (0, j))
        o_spec = pl.BlockSpec((tb_f, tn_f), lambda j, i, k: (i, j))
        scratch = [pltpu.VMEM((tb_f, tn_f), jnp.float32)]
        kernel = _make_ktiled_kernel(compute_dtype)
        semantics = ("parallel", "arbitrary", "arbitrary")
    elif n_out == 1:
        grid = (n_batch,)
        x_spec = pl.BlockSpec((tb_f, in_f), lambda i: (i, 0))
        w_spec = _w_block_spec((tn_f, in_f), lambda i: (0, 0), single_buffer=small_vmem)
        b_spec = pl.BlockSpec((1, tn_f), lambda i: (0, 0))
        o_spec = pl.BlockSpec((tb_f, tn_f), lambda i: (i, 0))
        scratch = []
        kernel = _make_single_out_kernel(compute_dtype)
        semantics = ("parallel",)   # batch tiles independent -> both v7x TCs busy
    else:
        grid = (n_out, n_batch)
        x_spec = pl.BlockSpec((tb_f, in_f), lambda j, i: (i, 0))
        w_spec = _w_block_spec((tn_f, in_f), lambda j, i: (j, 0), single_buffer=small_vmem)
        b_spec = pl.BlockSpec((1, tn_f), lambda j, i: (0, j))
        o_spec = pl.BlockSpec((tb_f, tn_f), lambda j, i: (i, j))
        scratch = [pltpu.VMEM((tn_f, in_f), compute_dtype)]
        kernel = _multi_out_kernel
        # Inner (batch) axis MUST stay "arbitrary": the w**2 hoist assumes it runs
        # sequentially from index 0 for each resident weight tile.
        semantics = ("parallel", "arbitrary")

    y = pl.pallas_call(
        kernel,
        out_shape=out_shape,
        grid_spec=pltpu.PrefetchScalarGridSpec(
            num_scalar_prefetch=0,
            grid=grid,
            in_specs=[x_spec, w_spec, b_spec],
            out_specs=o_spec,
            scratch_shapes=scratch),
        compiler_params=pltpu.CompilerParams(
            dimension_semantics=semantics,
            vmem_limit_bytes=vmem_limit),
    )(x_fed, w, b2d)

    if out_p != out_f:
        y = y[:, :out_f]
    return y


# --------------------------------------------------------------------------- #
# Parameter init mirroring PositiveLinear.reset_parameters()
# --------------------------------------------------------------------------- #
def init_positive_linear_params(key, in_features, out_features, bias=False):
    """xavier_uniform_ on (out, in), then |w|.sqrt(); bias ~ U(-bound, bound)."""
    k_w, k_b = jax.random.split(key)
    a = jnp.sqrt(6.0 / (in_features + out_features))
    w = jax.random.uniform(k_w, (out_features, in_features),
                           minval=-a, maxval=a, dtype=jnp.float32)
    log_weight = jnp.sqrt(jnp.abs(w))
    b = None
    if bias:
        bound = jnp.sqrt(1.0 / jnp.sqrt(in_features))
        b = jax.random.uniform(k_b, (out_features,),
                               minval=-bound, maxval=bound, dtype=jnp.float32)
    return log_weight, b


if __name__ == "__main__":
    key = jax.random.PRNGKey(0)
    ks = jax.random.split(key, 8)

    def ref(xv, lw, b=None):
        yv = xv @ (lw ** 2).T
        if b is not None:
            yv = yv + b
        return yv

    # Case 1: tiny module-default shapes (8, 32 -> 16), bias=False (XLA fallback path).
    x1 = jax.random.normal(ks[0], (8, 32), jnp.float32)
    lw1, _ = init_positive_linear_params(ks[1], 32, 16, bias=False)
    y1 = jax.block_until_ready(positive_linear(x1, lw1))
    assert y1.shape == (8, 16)
    assert jnp.allclose(y1, ref(x1, lw1), atol=1e-4, rtol=1e-4), "case1 mismatch"

    # Case 2: tiny with bias, f32 path (fallback).
    lw2, b2 = init_positive_linear_params(ks[2], 32, 16, bias=True)
    y2 = jax.block_until_ready(positive_linear(x1, lw2, b2, use_bf16=False))
    assert jnp.allclose(y2, ref(x1, lw2, b2), atol=1e-4, rtol=1e-4), "case2 mismatch"

    # Case 3: Pallas single-out-tile path (weight fully resident, batch-only grid),
    # f32 MXU path, then bf16 output dtype.
    x3 = jax.random.normal(ks[3], (96, 128), jnp.float32)
    lw3, b3 = init_positive_linear_params(ks[4], 128, 192, bias=True)
    y3 = jax.block_until_ready(
        positive_linear(x3, lw3, b3, use_bf16=False, force_pallas=True))
    assert y3.shape == (96, 192)
    assert jnp.allclose(y3, ref(x3, lw3, b3), atol=1e-4, rtol=1e-4), "case3 f32 mismatch"

    y3b = jax.block_until_ready(
        positive_linear(x3, lw3, b3, force_pallas=True, out_dtype=jnp.bfloat16))
    assert y3b.dtype == jnp.bfloat16
    assert jnp.allclose(y3b.astype(jnp.float32), ref(x3, lw3, b3),
                        atol=7e-2, rtol=7e-2), "case3 bf16-out mismatch"

    # Case 4: Pallas multi-out-tile path (hoisted w**2 scratch, x pre-cast to bf16),
    # non-divisible batch (272 = 2*128 + 16) and padded out_features (320 -> 384).
    x4 = jax.random.normal(ks[5], (272, 192), jnp.float32)
    lw4, b4 = init_positive_linear_params(ks[6], 192, 320, bias=True)
    y4 = jax.block_until_ready(
        positive_linear(x4, lw4, b4, force_pallas=True, tb=128, tn=128))
    assert y4.shape == (272, 320)
    assert jnp.allclose(y4, ref(x4, lw4, b4), atol=5e-2, rtol=5e-2), "case4 mismatch"

    # Case 5: Pallas K-tiled path (in_features 200 zero-padded to 256, 2 K steps).
    x5 = jax.random.normal(ks[7], (64, 200), jnp.float32)
    lw5, b5 = init_positive_linear_params(ks[1], 200, 256, bias=True)
    y5 = jax.block_until_ready(
        positive_linear(x5, lw5, b5, force_pallas=True, tb=64, tn=128, tk=128))
    assert y5.shape == (64, 256)
    assert jnp.allclose(y5, ref(x5, lw5, b5), atol=5e-2, rtol=5e-2), "case5 mismatch"

    print("KERNEL_OK")
</pallas_src>

<mosaic_0001>
module attributes {stable_mosaic.version = 11 : i64} {
  func.func @kernel(%arg0: i32, %arg1: memref<96x128xf32, #tpu.memory_space<vmem>>, %arg2: memref<256x128xf32, #tpu.memory_space<vmem>>, %arg3: memref<1x256xf32, #tpu.memory_space<vmem>>, %arg4: memref<96x256xf32, #tpu.memory_space<vmem>>) attributes {dimension_semantics = [#tpu.dimension_semantics<parallel>], iteration_bounds = array<i64: 1>, scalar_prefetch = 0 : i64, scratch_operands = 0 : i64, tpu.core_type = #tpu.core_type<tc>, window_params = [{transform_indices = @transform_0, window_bounds = array<i64: 96, 128>}, {pipeline_mode = #tpu.pipeline_mode<synchronous>, transform_indices = @transform_1, window_bounds = array<i64: 256, 128>}, {pipeline_mode = #tpu.pipeline_mode<synchronous>, transform_indices = @transform_2, window_bounds = array<i64: 1, 256>}, {transform_indices = @transform_3, window_bounds = array<i64: 96, 256>}]} {
    %c0 = arith.constant 0 : index
    %c0_0 = arith.constant 0 : index
    %0 = vector.load %arg2[%c0, %c0_0] : memref<256x128xf32, #tpu.memory_space<vmem>>, vector<256x128xf32>
    %1 = arith.mulf %0, %0 : vector<256x128xf32>
    %c0_1 = arith.constant 0 : index
    %c0_2 = arith.constant 0 : index
    %2 = vector.load %arg1[%c0_1, %c0_2] : memref<96x128xf32, #tpu.memory_space<vmem>>, vector<96x128xf32>
    %cst = arith.constant dense<0.000000e+00> : vector<96x256xf32>
    %3 = tpu.matmul %2, %1, %cst {dimension_numbers = #tpu.dot_dimension_numbers<[1], [1], [0], [0], [0, 0, 1, 0], [], []>} : vector<96x128xf32>, vector<256x128xf32>, vector<96x256xf32> -> vector<96x256xf32>
    %c0_3 = arith.constant 0 : index
    %c0_4 = arith.constant 0 : index
    %4 = vector.load %arg3[%c0_3, %c0_4] : memref<1x256xf32, #tpu.memory_space<vmem>>, vector<1x256xf32>
    %5 = vector.broadcast %4 : vector<1x256xf32> to vector<96x256xf32>
    %6 = arith.addf %3, %5 : vector<96x256xf32>
    %c0_5 = arith.constant 0 : index
    %c0_6 = arith.constant 0 : index
    %7 = vector.load %arg4[%c0_5, %c0_6] : memref<96x256xf32, #tpu.memory_space<vmem>>, vector<96x256xf32>
    tpu.vector_store %arg4[%c0_5, %c0_6], %6 {strides = array<i32>} : memref<96x256xf32, #tpu.memory_space<vmem>>, vector<96x256xf32>,
    return
  }
  func.func @transform_0(%arg0: i32) -> (i32, i32) {
    %c0_i32 = arith.constant 0 : i32
    %c0_i32_0 = arith.constant 0 : i32
    return %arg0, %c0_i32 : i32, i32
  }
  func.func @transform_1(%arg0: i32) -> (i32, i32) {
    %c0_i32 = arith.constant 0 : i32
    %c0_i32_0 = arith.constant 0 : i32
    %c0_i32_1 = arith.constant 0 : i32
    return %c0_i32, %c0_i32_0 : i32, i32
  }
  func.func @transform_2(%arg0: i32) -> (i32, i32) {
    %c0_i32 = arith.constant 0 : i32
    %c0_i32_0 = arith.constant 0 : i32
    %c0_i32_1 = arith.constant 0 : i32
    return %c0_i32, %c0_i32_0 : i32, i32
  }
  func.func @transform_3(%arg0: i32) -> (i32, i32) {
    %c0_i32 = arith.constant 0 : i32
    %c0_i32_0 = arith.constant 0 : i32
    return %arg0, %c0_i32 : i32, i32
  }
}

</mosaic_0001>

<bundles_post_ra>
// kernel: tpu_custom_call.1
= control target key start
LH: loop header
LB: loop body
LE: loop exit
PB: predicated region body
PF: predicated region fallthrough
CT: control target
= control target key end

     0   :  { %8 = vsyncpa [#allocation3], 0  ;;  %s595_s0 = inlined_call_operand.hbm [shape: f32[96,128], index: 0, kind: input, shape index: {}]   ;;  %s596_s1 = inlined_call_operand.hbm [shape: f32[256,128], index: 1, kind: input, shape index: {}]   ;;  %s597_s2 = inlined_call_operand.vmem [shape: f32[1,256], index: 2, kind: input, shape index: {}]   ;;  %s598_s3 = inlined_call_operand.hbm [shape: f32[96,256], index: 3, kind: output, shape index: {}]  }
   0x1   :  { %9 = vsyncpa [#allocation6], 0 }
   0x2   :  { %10 = vsyncpa [#allocation4], 0  ;;  %s493_s12 = smov [#allocation2]   ;;  %s421_s16 = scalar_lea.hbm %s595_s0, 1536 }
   0x3   :  { %s16_s13 = sshll.u32 %s493_s12, 4  ;;  %p422_p0 = scmp.ne.s32.totalorder %s595_s0, %s421_s16  ;;  %s17_s13 = int_to_ptr.vmem [resolvable:$true] %s16_s13 }
   0x4   :  { %p425_p1 = scmp.lt.u32.totalorder %s421_s16, %s595_s0 }
   0x6   :  { %p427_p2 = pnand %p425_p1, %p422_p0 }
   0x8   :  { %430 = shalt.err (!%p427_p2)
}
   0x9   :  { %s431_s21 = scalar_lea.vmem %s17_s13, 1536  ;;  %p436_p4 = scmp.lt.s32.totalorder %s17_s13, %s17_s13 }
   0xa   :  { %p432_p3 = scmp.ne.s32.totalorder %s17_s13, %s431_s21  ;;  %p437_p5 = scmp.lt.s32.totalorder %s431_s21, %s431_s21 }
   0xc   :  { %p438_p6 = por %p437_p5, %p436_p4 }
   0xe   :  { %p439_p7 = pnand %p438_p6, %p432_p3 }
  0x10   :  { %442 = shalt.err (!%p439_p7)
}
  0x11   :  { %s494_s22 = smov 128   ;;  %s495_s23 = smov 8  }
  0x12   :  { %22 = dma.hbm_to_vmem [thread:$0]  %s595_s0, 1536, %s17_s13, [#allocation3], %s494_s22, %s494_s22, %s495_s23  }
  0x13   :  { %s496_s26 = smov [#allocation5]   ;;  %s443_s30 = scalar_lea.hbm %s596_s1, 4096 }
  0x14   :  { %s28_s27 = sshll.u32 %s496_s26, 4  ;;  %p444_p8 = scmp.ne.s32.totalorder %s596_s1, %s443_s30  ;;  %s29_s27 = int_to_ptr.vmem [resolvable:$true] %s28_s27 }
  0x15   :  { %p447_p9 = scmp.lt.u32.totalorder %s443_s30, %s596_s1 }
  0x17   :  { %p449_p10 = pnand %p447_p9, %p444_p8 }
  0x19   :  { %452 = shalt.err (!%p449_p10)
}
  0x1a   :  { %s453_s8 = scalar_lea.vmem %s29_s27, 4096  ;;  %p458_p12 = scmp.lt.s32.totalorder %s29_s27, %s29_s27 }
  0x1b   :  { %p454_p11 = scmp.ne.s32.totalorder %s29_s27, %s453_s8  ;;  %p459_p13 = scmp.lt.s32.totalorder %s453_s8, %s453_s8 }
  0x1d   :  { %p460_p0 = por %p459_p13, %p458_p12 }
  0x1f   :  { %p461_p1 = pnand %p460_p0, %p454_p11 }
  0x21   :  { %464 = shalt.err (!%p461_p1)
}
  0x22   :  { %34 = dma.hbm_to_vmem [thread:$0]  %s596_s1, 4096, %s29_s27, [#allocation6], %s494_s22, %s494_s22, %s495_s23  }
  0x23   :  { %487 = dma.done.wait [#allocation3], 1536  }
  0x24   :  { %488 = vsyncadd [#allocation3], 4294965760 }
  0x25   :  { %489 = dma.done.wait [#allocation6], 4096  }
  0x26   :  { %490 = vsyncadd [#allocation6], 4294963200  ;;  %v59_v0 = vld [vmem:[#allocation5 + $0x80] sm:$0xff]  ;;  %v60_v1 = vld [vmem:[#allocation5 + $0x88] sm:$0xff] }
  0x27   :  { %v43_v2 = vld [vmem:[#allocation5] sm:$0xff]  ;;  %v91_v3 = vmul.f32 %v59_v0, %v59_v0  ;;  %v92_v4 = vmul.f32 %v60_v1, %v60_v1  ;;  %v44_v5 = vld [vmem:[#allocation5 + $0x8] sm:$0xff]  ;;  %v61_v7 = vld [vmem:[#allocation5 + $0x90] sm:$0xff] }
  0x28   :  { %v75_v6 = vmul.f32 %v43_v2, %v43_v2  ;;  %v62_v8 = vld [vmem:[#allocation5 + $0x98] sm:$0xff]  ;;  %v76_v9 = vmul.f32 %v44_v5, %v44_v5  ;;  %v93_v10 = vmul.f32 %v61_v7, %v61_v7  ;;  %v45_v13 = vld [vmem:[#allocation5 + $0x10] sm:$0xff]  ;;  %v63_v17 = vld [vmem:[#allocation5 + $0xa0] sm:$0xff] }
  0x29   :  { %v94_v11 = vmul.f32 %v62_v8, %v62_v8  ;;  %v366_v12 = vpack.c.bf16 %v92_v4, %v91_v3  ;;  %v46_v14 = vld [vmem:[#allocation5 + $0x18] sm:$0xff]  ;;  %v64_v18 = vld [vmem:[#allocation5 + $0xa8] sm:$0xff]  ;;  %v77_v19 = vmul.f32 %v45_v13, %v45_v13  ;;  %v95_v21 = vmul.f32 %v63_v17, %v63_v17  ;;  %v544_v24 = vld [vmem:[#allocation2] sm:$0xff] }
  0x2a   :  { %v368_v15 = vpack.c.bf16 %v76_v9, %v75_v6  ;;  %v78_v20 = vmul.f32 %v46_v14, %v46_v14  ;;  %v96_v22 = vmul.f32 %v64_v18, %v64_v18  ;;  %v47_v26 = vld [vmem:[#allocation5 + $0x20] sm:$0xff]  ;;  %v48_v27 = vld [vmem:[#allocation5 + $0x28] sm:$0xff]  ;;  %342 = vmatprep.mubr.f32.mxu0 %v544_v24  ;;  %v547_v28 = vld [vmem:[#allocation2 + $0x30] sm:$0xff] }
  0x2b   :  { %v370_v16 = vpack.c.bf16 %v94_v11, %v93_v10  ;;  %367 = vmatprep.subr.bf16.mxu0 %v366_v12  ;;  %398 = vmatprep.subr.bf16.mxu1 %v366_v12  ;;  %v65_v29 = vld [vmem:[#allocation5 + $0xb0] sm:$0xff]  ;;  %v66_v30 = vld [vmem:[#allocation5 + $0xb8] sm:$0xff]  ;;  %v79_v31 = vmul.f32 %v47_v26, %v47_v26  ;;  %v80_v32 = vmul.f32 %v48_v27, %v48_v27  ;;  %v67_v39 = vld [vmem:[#allocation5 + $0xc0] sm:$0xff] }
  0x2c   :  { %369 = vmatpush3.bf16.xpose.msra.mxu0 %v368_v15  ;;  %406 = vmatpush3.bf16.xpose.msra.mxu1 %v368_v15  ;;  %v372_v23 = vpack.c.bf16 %v78_v20, %v77_v19  ;;  %v374_v25 = vpack.c.bf16 %v96_v22, %v95_v21  ;;  %v97_v33 = vmul.f32 %v65_v29, %v65_v29  ;;  %v49_v37 = vld [vmem:[#allocation5 + $0x30] sm:$0xff]  ;;  %v50_v38 = vld [vmem:[#allocation5 + $0x38] sm:$0xff]  ;;  %v68_v40 = vld [vmem:[#allocation5 + $0xc8] sm:$0xff] }
  0x2d   :  { %371 = vmatprep.subr.bf16.mxu0 %v370_v16  ;;  %399 = vmatprep.subr.bf16.mxu1 %v370_v16  ;;  %v98_v34 = vmul.f32 %v66_v30, %v66_v30  ;;  %v376_v35 = vpack.c.bf16 %v80_v32, %v79_v31  ;;  %v81_v41 = vmul.f32 %v49_v37, %v49_v37  ;;  %v51_v47 = vld [vmem:[#allocation5 + $0x40] sm:$0xff]  ;;  %v52_v48 = vld [vmem:[#allocation5 + $0x48] sm:$0xff]  ;;  %v69_v49 = vld [vmem:[#allocation5 + $0xd0] sm:$0xff] }
  0x2e   :  { %354 = vmatprep.mubr.f32.mxu1 %v547_v28  ;;  %v82_v42 = vmul.f32 %v50_v38, %v50_v38  ;;  %v99_v43 = vmul.f32 %v67_v39, %v67_v39  ;;  %v100_v44 = vmul.f32 %v68_v40, %v68_v40  ;;  %v70_v50 = vld [vmem:[#allocation5 + $0xd8] sm:$0xff]  ;;  %v83_v51 = vmul.f32 %v51_v47, %v51_v47  ;;  %v53_v57 = vld [vmem:[#allocation5 + $0x50] sm:$0xff]  ;;  %v71_v59 = vld [vmem:[#allocation5 + $0xe0] sm:$0xff] }
  0x2f   :  { %v378_v36 = vpack.c.bf16 %v98_v34, %v97_v33  ;;  %v84_v52 = vmul.f32 %v52_v48, %v52_v48  ;;  %v101_v53 = vmul.f32 %v69_v49, %v69_v49  ;;  %v102_v54 = vmul.f32 %v70_v50, %v70_v50  ;;  %v54_v58 = vld [vmem:[#allocation5 + $0x58] sm:$0xff]  ;;  %v72_v60 = vld [vmem:[#allocation5 + $0xe8] sm:$0xff]  ;;  %v55_v3 = vld [vmem:[#allocation5 + $0x60] sm:$0xff] }
  0x30   :  { %v380_v45 = vpack.c.bf16 %v82_v42, %v81_v41  ;;  %v382_v46 = vpack.c.bf16 %v100_v44, %v99_v43  ;;  %v85_v61 = vmul.f32 %v53_v57, %v53_v57  ;;  %v86_v62 = vmul.f32 %v54_v58, %v54_v58  ;;  %v56_v4 = vld [vmem:[#allocation5 + $0x68] sm:$0xff]  ;;  %v73_v5 = vld [vmem:[#allocation5 + $0xf0] sm:$0xff]  ;;  %v74_v6 = vld [vmem:[#allocation5 + $0xf8] sm:$0xff] }
  0x31   :  { %v384_v55 = vpack.c.bf16 %v84_v52, %v83_v51  ;;  %v386_v56 = vpack.c.bf16 %v102_v54, %v101_v53  ;;  %v103_v63 = vmul.f32 %v71_v59, %v71_v59  ;;  %v104_v0 = vmul.f32 %v72_v60, %v72_v60  ;;  %v57_v13 = vld [vmem:[#allocation5 + $0x70] sm:$0xff]  ;;  %v58_v14 = vld [vmem:[#allocation5 + $0x78] sm:$0xff]  ;;  %v108_v18 = vld [vmem:[#allocation2 + $0x8] sm:$0xff] }
  0x32   :  { %v388_v1 = vpack.c.bf16 %v86_v62, %v85_v61  ;;  %v87_v7 = vmul.f32 %v55_v3, %v55_v3  ;;  %v88_v8 = vmul.f32 %v56_v4, %v56_v4  ;;  %v105_v9 = vmul.f32 %v73_v5, %v73_v5  ;;  %v114_v19 = vld [vmem:[#allocation2 + $0x38] sm:$0xff]  ;;  %v109_v20 = vld [vmem:[#allocation2 + $0x10] sm:$0xff]  ;;  %v115_v21 = vld [vmem:[#allocation2 + $0x40] sm:$0xff] }
  0x33   :  { %v390_v2 = vpack.c.bf16 %v104_v0, %v103_v63  ;;  %v106_v10 = vmul.f32 %v74_v6, %v74_v6  ;;  %v89_v15 = vmul.f32 %v57_v13, %v57_v13  ;;  %v90_v16 = vmul.f32 %v58_v14, %v58_v14  ;;  %v110_v22 = vld [vmem:[#allocation2 + $0x18] sm:$0xff]  ;;  %v117_v26 = vld [vmem:[#allocation2 + $0x50] sm:$0xff]  ;;  %v119_v31 = vld [vmem:[%s597_s2] sm:$0x3]  ;;  %s497_s2 = smov [#allocation7]  }
  0x34   :  { %373 = vmatpush3.bf16.xpose.msra.mxu0 %v372_v23  ;;  %407 = vmatpush3.bf16.xpose.msra.mxu1 %v372_v23  ;;  %v392_v11 = vpack.c.bf16 %v88_v8, %v87_v7  ;;  %v116_v23 = vld [vmem:[#allocation2 + $0x48] sm:$0xff]  ;;  %v118_v27 = vld [vmem:[#allocation2 + $0x58] sm:$0xff]  ;;  %s297_s11 = sshll.u32 %s497_s2, 4  ;;  %s298_s11 = int_to_ptr.vmem [resolvable:$true] %s297_s11 }
  0x35   :  { %375 = vmatprep.subr.bf16.mxu0 %v374_v25  ;;  %400 = vmatprep.subr.bf16.mxu1 %v374_v25  ;;  %v394_v12 = vpack.c.bf16 %v106_v10, %v105_v9  ;;  %v396_v17 = vpack.c.bf16 %v90_v16, %v89_v15  ;;  %v111_v25 = vld [vmem:[#allocation2 + $0x20] sm:$0xff]  ;;  %s465_s12 = scalar_lea.vmem %s298_s11, 3072  ;;  %p470_p3 = scmp.lt.s32.totalorder %s298_s11, %s298_s11 }
  0x36   :  { %p466_p2 = scmp.ne.s32.totalorder %s298_s11, %s465_s12  ;;  %p471_p4 = scmp.lt.s32.totalorder %s465_s12, %s465_s12 }
  0x38   :  { %p472_p5 = por %p471_p4, %p470_p3 }
  0x3a   :  { %p473_p6 = pnand %p472_p5, %p466_p2 }
  0x3c   :  { %377 = vmatpush3.bf16.xpose.msra.mxu0 %v376_v35  ;;  %408 = vmatpush3.bf16.xpose.msra.mxu1 %v376_v35 }
  0x3d   :  { %379 = vmatprep.subr.bf16.mxu0 %v378_v36  ;;  %401 = vmatprep.subr.bf16.mxu1 %v378_v36 }
  0x44   :  { %381 = vmatpush3.bf16.xpose.msra.mxu0 %v380_v45  ;;  %409 = vmatpush3.bf16.xpose.msra.mxu1 %v380_v45 }
  0x45   :  { %383 = vmatprep.subr.bf16.mxu0 %v382_v46  ;;  %402 = vmatprep.subr.bf16.mxu1 %v382_v46 }
  0x4c   :  { %385 = vmatpush3.bf16.xpose.msra.mxu0 %v384_v55  ;;  %410 = vmatpush3.bf16.xpose.msra.mxu1 %v384_v55 }
  0x4d   :  { %387 = vmatprep.subr.bf16.mxu0 %v386_v56  ;;  %403 = vmatprep.subr.bf16.mxu1 %v386_v56 }
  0x54   :  { %389 = vmatpush3.bf16.xpose.msra.mxu0 %v388_v1  ;;  %411 = vmatpush3.bf16.xpose.msra.mxu1 %v388_v1 }
  0x55   :  { %391 = vmatprep.subr.bf16.mxu0 %v390_v2  ;;  %404 = vmatprep.subr.bf16.mxu1 %v390_v2 }
  0x5c   :  { %393 = vmatpush3.bf16.xpose.msra.mxu0 %v392_v11  ;;  %412 = vmatpush3.bf16.xpose.msra.mxu1 %v392_v11 }
  0x5d   :  { %395 = vmatprep.subr.bf16.mxu0 %v394_v12  ;;  %405 = vmatprep.subr.bf16.mxu1 %v394_v12 }
  0x64   :  { %397 = vmatpush3.bf16.xpose.msra.mxu0 %v396_v17  ;;  %413 = vmatpush3.bf16.xpose.msra.mxu1 %v396_v17 }
  0x6b   :  { %343 = vmatmul.mubr.f32.vlgmr.msra.gmra.mrb[0].mxu0 %v544_v24  ;;  %355 = vmatmul.mubr.f32.vlgmr.msra.gmra.mrb[0].mxu1 %v547_v28  ;;  %v112_v24 = vld [vmem:[#allocation2 + $0x28] sm:$0xff]  ;;  %v121_v28 = vlaneseq }
  0x6c   :  { %344 = vmatprep.mubr.f32.mxu0 %v108_v18  ;;  %356 = vmatprep.mubr.f32.mxu1 %v114_v19 }
  0x6d   :  { %v122_v29 = vshrl.u32 %v121_v28, 7 }
  0x6f   :  { %345 = vmatmul.mubr.f32.gmra.mrb[2].mxu0 %v108_v18  ;;  %357 = vmatmul.mubr.f32.gmra.mrb[2].mxu1 %v114_v19  ;;  %v123_v30 = vsub.s32 0, %v122_v29  ;;  %v127_v32 = vsub.s32 1, %v122_v29 }
  0x70   :  { %346 = vmatprep.mubr.f32.mxu0 %v109_v20  ;;  %358 = vmatprep.mubr.f32.mxu1 %v115_v21 }
  0x71   :  { %v555_v33 = vrot.slane %v119_v31, %v123_v30  ;;  %v557_v34 = vrot.slane %v119_v31, %v127_v32 }
  0x73   :  { %347 = vmatmul.mubr.f32.gmra.mrb[4].mxu0 %v109_v20  ;;  %359 = vmatmul.mubr.f32.gmra.mrb[4].mxu1 %v115_v21 }
  0x74   :  { %348 = vmatprep.mubr.f32.mxu0 %v110_v22  ;;  %360 = vmatprep.mubr.f32.mxu1 %v116_v23 }
  0x77   :  { %349 = vmatmul.mubr.f32.gmra.mrb[6].mxu0 %v110_v22  ;;  %361 = vmatmul.mubr.f32.gmra.mrb[6].mxu1 %v116_v23 }
  0x78   :  { %350 = vmatprep.mubr.f32.mxu0 %v111_v25  ;;  %362 = vmatprep.mubr.f32.mxu1 %v117_v26 }
  0x7b   :  { %351 = vmatmul.mubr.f32.gmra.mrb[8].mxu0 %v111_v25  ;;  %363 = vmatmul.mubr.f32.gmra.mrb[8].mxu1 %v117_v26 }
  0x7c   :  { %352 = vmatprep.mubr.f32.mxu0 %v112_v24  ;;  %364 = vmatprep.mubr.f32.mxu1 %v118_v27 }
  0x7f   :  { %353 = vmatmul.mubr.f32.gmra.mrb[10].mxu0 %v112_v24  ;;  %365 = vmatmul.mubr.f32.gmra.mrb[10].mxu1 %v118_v27 }
 0x13e   :  { %v197_v35 = vpop.f32.mrb[0].mxu0  ;;  %v233_v36 = vpop.f32.mrb[0].mxu1 }
 0x13f   :  { %v198_v37 = vadd.f32 %v197_v35, %v555_v33  ;;  %v234_v38 = vadd.f32 %v233_v36, %v555_v33  ;;  %v199_v39 = vpop.f32.mrb[1].mxu0  ;;  %v235_v40 = vpop.f32.mrb[1].mxu1 }
 0x140   :  { %v200_v41 = vadd.f32 %v199_v39, %v557_v34  ;;  %v236_v42 = vadd.f32 %v235_v40, %v557_v34 }
 0x141   :  { %268 = vst [vmem:[#allocation7] sm:$0xff] %v198_v37  ;;  %280 = vst [vmem:[#allocation7 + $0x60] sm:$0xff] %v234_v38 }
 0x142   :  { %269 = vst [vmem:[#allocation7 + $0x8] sm:$0xff] %v200_v41  ;;  %281 = vst [vmem:[#allocation7 + $0x68] sm:$0xff] %v236_v42  ;;  %v203_v43 = vpop.f32.mrb[2].mxu0  ;;  %v239_v44 = vpop.f32.mrb[2].mxu1 }
 0x143   :  { %v204_v45 = vadd.f32 %v203_v43, %v555_v33  ;;  %v240_v46 = vadd.f32 %v239_v44, %v555_v33  ;;  %v205_v47 = vpop.f32.mrb[3].mxu0  ;;  %v241_v48 = vpop.f32.mrb[3].mxu1 }
 0x144   :  { %v206_v49 = vadd.f32 %v205_v47, %v557_v34  ;;  %v242_v50 = vadd.f32 %v241_v48, %v557_v34 }
 0x145   :  { %270 = vst [vmem:[#allocation7 + $0x10] sm:$0xff] %v204_v45  ;;  %282 = vst [vmem:[#allocation7 + $0x70] sm:$0xff] %v240_v46 }
 0x146   :  { %271 = vst [vmem:[#allocation7 + $0x18] sm:$0xff] %v206_v49  ;;  %283 = vst [vmem:[#allocation7 + $0x78] sm:$0xff] %v242_v50  ;;  %v209_v51 = vpop.f32.mrb[4].mxu0  ;;  %v245_v52 = vpop.f32.mrb[4].mxu1 }
 0x147   :  { %v210_v53 = vadd.f32 %v209_v51, %v555_v33  ;;  %v246_v54 = vadd.f32 %v245_v52, %v555_v33  ;;  %v211_v55 = vpop.f32.mrb[5].mxu0  ;;  %v247_v56 = vpop.f32.mrb[5].mxu1 }
 0x148   :  { %v212_v57 = vadd.f32 %v211_v55, %v557_v34  ;;  %v248_v58 = vadd.f32 %v247_v56, %v557_v34 }
 0x149   :  { %272 = vst [vmem:[#allocation7 + $0x20] sm:$0xff] %v210_v53  ;;  %284 = vst [vmem:[#allocation7 + $0x80] sm:$0xff] %v246_v54 }
 0x14a   :  { %273 = vst [vmem:[#allocation7 + $0x28] sm:$0xff] %v212_v57  ;;  %285 = vst [vmem:[#allocation7 + $0x88] sm:$0xff] %v248_v58  ;;  %v215_v59 = vpop.f32.mrb[6].mxu0  ;;  %v251_v60 = vpop.f32.mrb[6].mxu1 }
 0x14b   :  { %v216_v61 = vadd.f32 %v215_v59, %v555_v33  ;;  %v252_v62 = vadd.f32 %v251_v60, %v555_v33  ;;  %v217_v63 = vpop.f32.mrb[7].mxu0  ;;  %v253_v0 = vpop.f32.mrb[7].mxu1 }
 0x14c   :  { %v218_v1 = vadd.f32 %v217_v63, %v557_v34  ;;  %v254_v2 = vadd.f32 %v253_v0, %v557_v34 }
 0x14d   :  { %274 = vst [vmem:[#allocation7 + $0x30] sm:$0xff] %v216_v61  ;;  %286 = vst [vmem:[#allocation7 + $0x90] sm:$0xff] %v252_v62 }
 0x14e   :  { %275 = vst [vmem:[#allocation7 + $0x38] sm:$0xff] %v218_v1  ;;  %287 = vst [vmem:[#allocation7 + $0x98] sm:$0xff] %v254_v2  ;;  %v221_v3 = vpop.f32.mrb[8].mxu0  ;;  %v257_v4 = vpop.f32.mrb[8].mxu1 }
 0x14f   :  { %v222_v5 = vadd.f32 %v221_v3, %v555_v33  ;;  %v258_v6 = vadd.f32 %v257_v4, %v555_v33  ;;  %v223_v7 = vpop.f32.mrb[9].mxu0  ;;  %v259_v8 = vpop.f32.mrb[9].mxu1 }
 0x150   :  { %v224_v9 = vadd.f32 %v223_v7, %v557_v34  ;;  %v260_v10 = vadd.f32 %v259_v8, %v557_v34 }
 0x151   :  { %276 = vst [vmem:[#allocation7 + $0x40] sm:$0xff] %v222_v5  ;;  %288 = vst [vmem:[#allocation7 + $0xa0] sm:$0xff] %v258_v6 }
 0x152   :  { %277 = vst [vmem:[#allocation7 + $0x48] sm:$0xff] %v224_v9  ;;  %289 = vst [vmem:[#allocation7 + $0xa8] sm:$0xff] %v260_v10  ;;  %v227_v11 = vpop.f32.mrb[10].mxu0  ;;  %v263_v12 = vpop.f32.mrb[10].mxu1 }
 0x153   :  { %v228_v13 = vadd.f32 %v227_v11, %v555_v33  ;;  %v264_v14 = vadd.f32 %v263_v12, %v555_v33  ;;  %v229_v15 = vpop.f32.mrb[11].mxu0  ;;  %v265_v16 = vpop.f32.mrb[11].mxu1 }
 0x154   :  { %v230_v17 = vadd.f32 %v229_v15, %v557_v34  ;;  %v266_v18 = vadd.f32 %v265_v16, %v557_v34 }
 0x155   :  { %278 = vst [vmem:[#allocation7 + $0x50] sm:$0xff] %v228_v13  ;;  %290 = vst [vmem:[#allocation7 + $0xb0] sm:$0xff] %v264_v14 }
 0x156   :  { %279 = vst [vmem:[#allocation7 + $0x58] sm:$0xff] %v230_v17  ;;  %291 = vst [vmem:[#allocation7 + $0xb8] sm:$0xff] %v266_v18 }
 0x157   :  { %476 = shalt.err (!%p473_p6)
}
 0x158   :  { %s477_s15 = scalar_lea.hbm %s598_s3, 3072 }
 0x159   :  { %p478_p7 = scmp.ne.s32.totalorder %s598_s3, %s477_s15  ;;  %p481_p8 = scmp.lt.u32.totalorder %s477_s15, %s598_s3 }
 0x15b   :  { %p483_p9 = pnand %p481_p8, %p478_p7 }
 0x15d   :  { %486 = shalt.err (!%p483_p9)
}
 0x15e   :  { %s498_s20 = smov 256   ;;  %s499_s21 = smov 16  }
 0x15f   :  { %303 = dma.vmem_to_hbm [thread:$0]  %s298_s11, 3072, %s598_s3, [#allocation4], %s498_s20, %s498_s20, %s499_s21  }
 0x160   :  { %491 = dma.done.wait [#allocation4], 3072  }
 0x161   :  { %492 = vsyncadd [#allocation4], 4294964224 }
 0x162   :  { %307 = vsyncpa [#allocation3], 1 }
 0x163   :  { %308 = vsyncpa [#allocation6], 1 }
 0x164   :  { %309 = vsyncpa [#allocation4], 1 }

</bundles_post_ra>
